<compile_context>
chip_gen: v7x
topology: tpu7x:2x2x1
jax: 0.10.0
libtpu: 0.0.40
codegen_flags: <defaults>
</compile_context>

<pallas_src>
import numpy as np
import jax
import jax.numpy as jnp
from jax.experimental import pallas as pl
from jax.experimental.pallas import tpu as pltpu


def _cgca_kernel(x_ref, mask_ref, w1t_ref, b1_ref, w2_ref, b2_ref, o_ref):
    """One grid step: a (TB, C, HW) slab, fused pool -> MLP -> sigmoid -> rescale.

    x_ref:    (TB, C, HW)  input slab (C on sublanes, HW on lanes)
    mask_ref: (S, HW)      normalized center-region masks (1/area inside region)
    w1t_ref:  (C, Ch)      Linear1 weight, pre-transposed (channels on sublanes)
    b1_ref:   (1, Ch)      Linear1 bias
    w2_ref:   (C, Ch)      Linear2 weight (PyTorch layout)
    b2_ref:   (C, 1)       Linear2 bias
    o_ref:    (TB, C, HW)  output slab
    """
    TB, C, HW = x_ref.shape
    S = mask_ref.shape[0]
    Ch = w1t_ref.shape[1]

    mask = mask_ref[...]
    w1t = w1t_ref[...]
    b1 = b1_ref[...]
    w2 = w2_ref[...]
    b2 = b2_ref[...]

    # Multi-scale center pooling for the whole slab in ONE MXU matmul:
    # (TB, C, HW) -> (TB*C, HW) is a pure leading-dim merge (no relayout when
    # C is a sublane multiple), contracted over HW against the (S, HW) masks.
    pooled = jax.lax.dot_general(
        x_ref[...].reshape(TB * C, HW), mask,
        dimension_numbers=(((1,), (1,)), ((), ())),
        preferred_element_type=jnp.float32)              # (TB*C, S)
    pooled = pooled.reshape(TB, C, S)                    # free leading-dim split

    # Shared MLP. Ch = C // reduction_ratio is tiny (2 here), so both Linear
    # layers are Ch VPU broadcast-multiplies + sublane/lane reductions instead
    # of 2*TB skinny MXU pushes; the mean over scales commutes with the affine
    # second layer, so it is folded in right after the ReLU.
    mlp_mean = jnp.zeros((TB, C, 1), jnp.float32)
    for j in range(Ch):                                  # tiny static unroll
        w1_j = w1t[:, j:j + 1].reshape(1, C, 1)
        b1_j = b1[:, j:j + 1].reshape(1, 1, 1)
        h_j = jnp.sum(pooled * w1_j, axis=1, keepdims=True) + b1_j   # (TB,1,S)
        h_j = jnp.maximum(h_j, 0.0)
        hm_j = jnp.mean(h_j, axis=2, keepdims=True)                   # (TB,1,1)
        mlp_mean = mlp_mean + hm_j * w2[:, j:j + 1].reshape(1, C, 1)  # (TB,C,1)
    attn = jax.nn.sigmoid(mlp_mean + b2.reshape(1, C, 1))             # (TB,C,1)

    # Channel-wise rescale: re-read x from VMEM (instead of keeping the pooling
    # operand live across the whole store) and store lane-dense.
    o_ref[...] = (x_ref[...] * attn).astype(o_ref.dtype)


def build_center_pool_masks(H, W):
    """(S, H*W) masks; mask[s] averages the center region used for scale s.

    Mirrors the PyTorch module exactly: scales = 1, 3, ..., <= min(H, W);
    the full-image average is only used when a scale equals min(H, W)
    (which, as in PyTorch, never happens for even min(H, W)).
    """
    max_size = min(H, W)
    scales = list(range(1, max_size + 1, 2))
    S = len(scales)
    mask = np.zeros((S, H, W), dtype=np.float32)
    ch, cw = H // 2, W // 2
    for i, s in enumerate(scales):
        if s == min(H, W):
            mask[i, :, :] = 1.0 / (H * W)
        else:
            half = s // 2
            sh, eh = max(0, ch - half), min(H, ch + half + 1)
            sw, ew = max(0, cw - half), min(W, cw + half + 1)
            area = (eh - sh) * (ew - sw)
            mask[i, sh:eh, sw:ew] = 1.0 / area
    return jnp.asarray(mask.reshape(S, H * W))


def _tpu_vmem_and_cores():
    """Generation-aware VMEM capacity and TensorCore count (best effort)."""
    vmem_cap = 128 << 20
    num_cores = 1
    try:
        info = pltpu.get_tpu_info()
        vmem_cap = int(getattr(info, "vmem_capacity_bytes", vmem_cap))
        for attr in ("num_cores", "num_tensorcores", "tensorcore_count"):
            v = getattr(info, attr, None)
            if v:
                num_cores = int(v)
                break
    except Exception:
        pass
    return vmem_cap, max(1, num_cores)


def _choose_block_b(B, C, HW, *, num_cores, vmem_budget, invariant_bytes):
    """How many images to fold into one grid-step slab."""
    per_img = C * HW * 4
    # Room for double-buffered in + out slabs plus elementwise temporaries.
    max_slab = max(per_img, (vmem_budget - invariant_bytes - (2 << 20)) // 6)
    target_slab = min(8 << 20, max_slab)     # multi-MiB DMAs ~ HBM roofline
    tb = max(1, target_slab // per_img)
    if num_cores >= 2 and B >= num_cores:
        tb = min(tb, B // num_cores)         # keep every TensorCore busy (v7x)
    tb = int(max(1, min(tb, B)))
    while B % tb:                            # block must evenly tile the batch
        tb -= 1
    return tb


def center_guided_channel_attention(x, mask, w1, b1, w2, b2, *, block_b=None):
    """x: (B, C, H, W) f32; w1: (Ch, C); b1: (Ch,); w2: (C, Ch); b2: (C,)."""
    B, C, H, W = x.shape
    HW = H * W
    S = mask.shape[0]
    Ch = w1.shape[0]

    # No padding: the block spans the full HW dim, so unaligned spatial sizes
    # cost at most a masked tail store instead of an extra HBM pad/slice pass.
    x_flat = x.reshape(B, C, HW)

    vmem_cap, num_cores = _tpu_vmem_and_cores()
    vmem_budget = int(vmem_cap * 0.75)

    mask_bytes = S * HW * 4
    mask_single = mask_bytes > (1 << 20)     # single-buffer a large mask bank
    small_bytes = 4 * (2 * C * Ch + Ch + C)  # w1t, w2, b1, b2 (negligible)
    invariant_bytes = (1 if mask_single else 2) * mask_bytes + 2 * small_bytes

    if block_b is None:
        TB = _choose_block_b(B, C, HW, num_cores=num_cores,
                             vmem_budget=vmem_budget,
                             invariant_bytes=invariant_bytes)
    else:
        TB = int(block_b)
        assert B % TB == 0, "block_b must divide the batch"
    grid = B // TB

    per_img = C * HW * 4
    vmem_needed = 6 * TB * per_img + invariant_bytes + (2 << 20)
    vmem_limit = int(min(max(vmem_needed, 32 << 20), int(vmem_cap * 0.9)))

    mask_kwargs = {"pipeline_mode": pl.Buffered(1)} if mask_single else {}

    w1t = w1.T                      # (C, Ch): channels stay on sublanes
    b1r = b1.reshape(1, Ch)
    b2r = b2.reshape(C, 1)

    out = pl.pallas_call(
        _cgca_kernel,
        out_shape=jax.ShapeDtypeStruct((B, C, HW), x.dtype),
        grid_spec=pltpu.PrefetchScalarGridSpec(
            num_scalar_prefetch=0,
            grid=(grid,),
            in_specs=[
                pl.BlockSpec((TB, C, HW), lambda i: (i, 0, 0)),          # x slab
                pl.BlockSpec((S, HW), lambda i: (0, 0), **mask_kwargs),  # masks
                pl.BlockSpec((C, Ch), lambda i: (0, 0)),                 # W1^T
                pl.BlockSpec((1, Ch), lambda i: (0, 0)),                 # b1
                pl.BlockSpec((C, Ch), lambda i: (0, 0)),                 # W2
                pl.BlockSpec((C, 1), lambda i: (0, 0)),                  # b2
            ],
            out_specs=pl.BlockSpec((TB, C, HW), lambda i: (i, 0, 0)),
        ),
        compiler_params=pltpu.CompilerParams(
            dimension_semantics=("parallel",),
            vmem_limit_bytes=vmem_limit),
    )(x_flat, mask, w1t, b1r, w2, b2r)

    return out.reshape(B, C, H, W)


def reference(x, mask, w1, b1, w2, b2):
    """Pure-JAX reference matching the PyTorch forward."""
    B, C, H, W = x.shape
    xf = x.reshape(B, C, H * W)
    pooled = jnp.einsum('sk,bck->bsc', mask, xf)        # (B, S, C)
    h = jnp.maximum(pooled @ w1.T + b1, 0.0)            # (B, S, Ch)
    mlp = h @ w2.T + b2                                 # (B, S, C)
    attn = jax.nn.sigmoid(jnp.mean(mlp, axis=1))        # (B, C)
    return x * attn[:, :, None, None]


if __name__ == "__main__":
    B, C, H, W = 2, 32, 16, 16
    reduction_ratio = 16
    hidden = C // reduction_ratio  # 2

    key = jax.random.PRNGKey(0)
    kx, k1, k2, k3, k4, kx2 = jax.random.split(key, 6)

    x = jax.random.normal(kx, (B, C, H, W), dtype=jnp.float32)

    # deterministic Linear-style init (uniform in +/- 1/sqrt(fan_in))
    bound1 = 1.0 / np.sqrt(C)
    w1 = jax.random.uniform(k1, (hidden, C), jnp.float32, -bound1, bound1)
    b1 = jax.random.uniform(k2, (hidden,), jnp.float32, -bound1, bound1)
    bound2 = 1.0 / np.sqrt(hidden)
    w2 = jax.random.uniform(k3, (C, hidden), jnp.float32, -bound2, bound2)
    b2 = jax.random.uniform(k4, (C,), jnp.float32, -bound2, bound2)

    mask = build_center_pool_masks(H, W)
    out = jax.block_until_ready(
        center_guided_channel_attention(x, mask, w1, b1, w2, b2))
    ref = jax.block_until_ready(reference(x, mask, w1, b1, w2, b2))
    np.testing.assert_allclose(np.asarray(out), np.asarray(ref),
                               rtol=1e-5, atol=1e-5)

    # Also exercise a non-128-aligned spatial size (the no-pad / no-slice path).
    H2, W2 = 14, 14
    x2 = jax.random.normal(kx2, (B, C, H2, W2), dtype=jnp.float32)
    mask2 = build_center_pool_masks(H2, W2)
    out2 = jax.block_until_ready(
        center_guided_channel_attention(x2, mask2, w1, b1, w2, b2))
    ref2 = jax.block_until_ready(reference(x2, mask2, w1, b1, w2, b2))
    np.testing.assert_allclose(np.asarray(out2), np.asarray(ref2),
                               rtol=1e-5, atol=1e-5)

    print("KERNEL_OK")
</pallas_src>

<mosaic_0001>
module attributes {stable_mosaic.version = 11 : i64} {
  func.func @_cgca_kernel(%arg0: i32, %arg1: memref<2x32x256xf32, #tpu.memory_space<vmem>>, %arg2: memref<8x256xf32, #tpu.memory_space<vmem>>, %arg3: memref<32x2xf32, #tpu.memory_space<vmem>>, %arg4: memref<1x2xf32, #tpu.memory_space<vmem>>, %arg5: memref<32x2xf32, #tpu.memory_space<vmem>>, %arg6: memref<32x1xf32, #tpu.memory_space<vmem>>, %arg7: memref<2x32x256xf32, #tpu.memory_space<vmem>>) attributes {dimension_semantics = [#tpu.dimension_semantics<parallel>], iteration_bounds = array<i64: 1>, scalar_prefetch = 0 : i64, scratch_operands = 0 : i64, tpu.core_type = #tpu.core_type<tc>, window_params = [{transform_indices = @transform_0, window_bounds = array<i64: 2, 32, 256>}, {pipeline_mode = #tpu.pipeline_mode<synchronous>, transform_indices = @transform_1, window_bounds = array<i64: 8, 256>}, {pipeline_mode = #tpu.pipeline_mode<synchronous>, transform_indices = @transform_2, window_bounds = array<i64: 32, 2>}, {pipeline_mode = #tpu.pipeline_mode<synchronous>, transform_indices = @transform_3, window_bounds = array<i64: 1, 2>}, {pipeline_mode = #tpu.pipeline_mode<synchronous>, transform_indices = @transform_4, window_bounds = array<i64: 32, 2>}, {pipeline_mode = #tpu.pipeline_mode<synchronous>, transform_indices = @transform_5, window_bounds = array<i64: 32, 1>}, {transform_indices = @transform_6, window_bounds = array<i64: 2, 32, 256>}]} {
    %c0 = arith.constant 0 : index
    %c0_0 = arith.constant 0 : index
    %0 = vector.load %arg2[%c0, %c0_0] : memref<8x256xf32, #tpu.memory_space<vmem>>, vector<8x256xf32>
    %c0_1 = arith.constant 0 : index
    %c0_2 = arith.constant 0 : index
    %1 = vector.load %arg3[%c0_1, %c0_2] : memref<32x2xf32, #tpu.memory_space<vmem>>, vector<32x2xf32>
    %c0_3 = arith.constant 0 : index
    %c0_4 = arith.constant 0 : index
    %2 = vector.load %arg4[%c0_3, %c0_4] : memref<1x2xf32, #tpu.memory_space<vmem>>, vector<1x2xf32>
    %c0_5 = arith.constant 0 : index
    %c0_6 = arith.constant 0 : index
    %3 = vector.load %arg5[%c0_5, %c0_6] : memref<32x2xf32, #tpu.memory_space<vmem>>, vector<32x2xf32>
    %c0_7 = arith.constant 0 : index
    %c0_8 = arith.constant 0 : index
    %4 = vector.load %arg6[%c0_7, %c0_8] : memref<32x1xf32, #tpu.memory_space<vmem>>, vector<32x1xf32>
    %c0_9 = arith.constant 0 : index
    %c0_10 = arith.constant 0 : index
    %c0_11 = arith.constant 0 : index
    %5 = vector.load %arg1[%c0_9, %c0_10, %c0_11] : memref<2x32x256xf32, #tpu.memory_space<vmem>>, vector<2x32x256xf32>
    %6 = vector.shape_cast %5 : vector<2x32x256xf32> to vector<64x256xf32>
    %cst = arith.constant dense<0.000000e+00> : vector<64x8xf32>
    %7 = tpu.matmul %6, %0, %cst {dimension_numbers = #tpu.dot_dimension_numbers<[1], [1], [0], [0], [0, 0, 1, 0], [], []>} : vector<64x256xf32>, vector<8x256xf32>, vector<64x8xf32> -> vector<64x8xf32>
    %8 = vector.shape_cast %7 : vector<64x8xf32> to vector<2x32x8xf32>
    %cst_12 = arith.constant 0.000000e+00 : f32
    %9 = vector.broadcast %cst_12 : f32 to vector<2x32x1xf32>
    %10 = vector.extract_strided_slice %1 {offsets = [0, 0], sizes = [32, 1], strides = [1, 1]} : vector<32x2xf32> to vector<32x1xf32>
    %11 = vector.shape_cast %10 : vector<32x1xf32> to vector<1x32x1xf32>
    %12 = vector.extract_strided_slice %2 {offsets = [0, 0], sizes = [1, 1], strides = [1, 1]} : vector<1x2xf32> to vector<1x1xf32>
    %13 = vector.shape_cast %12 : vector<1x1xf32> to vector<1x1x1xf32>
    %14 = vector.broadcast %11 : vector<1x32x1xf32> to vector<2x32x8xf32>
    %15 = arith.mulf %8, %14 : vector<2x32x8xf32>
    %cst_13 = arith.constant dense<0.000000e+00> : vector<2x8xf32>
    %16 = vector.multi_reduction <add>, %15, %cst_13 [1] : vector<2x32x8xf32> to vector<2x8xf32>
    %17 = vector.shape_cast %16 : vector<2x8xf32> to vector<2x1x8xf32>
    %18 = vector.broadcast %13 : vector<1x1x1xf32> to vector<2x1x8xf32>
    %19 = arith.addf %17, %18 : vector<2x1x8xf32>
    %cst_14 = arith.constant 0.000000e+00 : f32
    %20 = vector.broadcast %cst_14 : f32 to vector<2x1x8xf32>
    %21 = arith.maximumf %19, %20 : vector<2x1x8xf32>
    %cst_15 = arith.constant dense<0.000000e+00> : vector<2x1xf32>
    %22 = vector.multi_reduction <add>, %21, %cst_15 [2] : vector<2x1x8xf32> to vector<2x1xf32>
    %23 = vector.shape_cast %22 : vector<2x1xf32> to vector<2x1x1xf32>
    %cst_16 = arith.constant 8.000000e+00 : f32
    %24 = vector.broadcast %cst_16 : f32 to vector<2x1x1xf32>
    %25 = arith.divf %23, %24 : vector<2x1x1xf32>
    %26 = vector.extract_strided_slice %3 {offsets = [0, 0], sizes = [32, 1], strides = [1, 1]} : vector<32x2xf32> to vector<32x1xf32>
    %27 = vector.shape_cast %26 : vector<32x1xf32> to vector<1x32x1xf32>
    %28 = vector.broadcast %25 : vector<2x1x1xf32> to vector<2x32x1xf32>
    %29 = vector.broadcast %27 : vector<1x32x1xf32> to vector<2x32x1xf32>
    %30 = arith.mulf %28, %29 : vector<2x32x1xf32>
    %31 = arith.addf %9, %30 : vector<2x32x1xf32>
    %32 = vector.extract_strided_slice %1 {offsets = [0, 1], sizes = [32, 1], strides = [1, 1]} : vector<32x2xf32> to vector<32x1xf32>
    %33 = vector.shape_cast %32 : vector<32x1xf32> to vector<1x32x1xf32>
    %34 = vector.extract_strided_slice %2 {offsets = [0, 1], sizes = [1, 1], strides = [1, 1]} : vector<1x2xf32> to vector<1x1xf32>
    %35 = vector.shape_cast %34 : vector<1x1xf32> to vector<1x1x1xf32>
    %36 = vector.broadcast %33 : vector<1x32x1xf32> to vector<2x32x8xf32>
    %37 = arith.mulf %8, %36 : vector<2x32x8xf32>
    %cst_17 = arith.constant dense<0.000000e+00> : vector<2x8xf32>
    %38 = vector.multi_reduction <add>, %37, %cst_17 [1] : vector<2x32x8xf32> to vector<2x8xf32>
    %39 = vector.shape_cast %38 : vector<2x8xf32> to vector<2x1x8xf32>
    %40 = vector.broadcast %35 : vector<1x1x1xf32> to vector<2x1x8xf32>
    %41 = arith.addf %39, %40 : vector<2x1x8xf32>
    %cst_18 = arith.constant 0.000000e+00 : f32
    %42 = vector.broadcast %cst_18 : f32 to vector<2x1x8xf32>
    %43 = arith.maximumf %41, %42 : vector<2x1x8xf32>
    %cst_19 = arith.constant dense<0.000000e+00> : vector<2x1xf32>
    %44 = vector.multi_reduction <add>, %43, %cst_19 [2] : vector<2x1x8xf32> to vector<2x1xf32>
    %45 = vector.shape_cast %44 : vector<2x1xf32> to vector<2x1x1xf32>
    %cst_20 = arith.constant 8.000000e+00 : f32
    %46 = vector.broadcast %cst_20 : f32 to vector<2x1x1xf32>
    %47 = arith.divf %45, %46 : vector<2x1x1xf32>
    %48 = vector.extract_strided_slice %3 {offsets = [0, 1], sizes = [32, 1], strides = [1, 1]} : vector<32x2xf32> to vector<32x1xf32>
    %49 = vector.shape_cast %48 : vector<32x1xf32> to vector<1x32x1xf32>
    %50 = vector.broadcast %47 : vector<2x1x1xf32> to vector<2x32x1xf32>
    %51 = vector.broadcast %49 : vector<1x32x1xf32> to vector<2x32x1xf32>
    %52 = arith.mulf %50, %51 : vector<2x32x1xf32>
    %53 = arith.addf %31, %52 : vector<2x32x1xf32>
    %54 = vector.shape_cast %4 : vector<32x1xf32> to vector<1x32x1xf32>
    %55 = vector.broadcast %54 : vector<1x32x1xf32> to vector<2x32x1xf32>
    %56 = arith.addf %53, %55 : vector<2x32x1xf32>
    %57 = arith.negf %56 : vector<2x32x1xf32>
    %58 = math.exp %57 : vector<2x32x1xf32>
    %cst_21 = arith.constant 1.000000e+00 : f32
    %59 = vector.broadcast %cst_21 : f32 to vector<2x32x1xf32>
    %60 = arith.addf %59, %58 : vector<2x32x1xf32>
    %61 = arith.divf %59, %60 : vector<2x32x1xf32>
    %c0_22 = arith.constant 0 : index
    %c0_23 = arith.constant 0 : index
    %c0_24 = arith.constant 0 : index
    %62 = vector.load %arg1[%c0_22, %c0_23, %c0_24] : memref<2x32x256xf32, #tpu.memory_space<vmem>>, vector<2x32x256xf32>
    %63 = vector.broadcast %61 : vector<2x32x1xf32> to vector<2x32x256xf32>
    %64 = arith.mulf %62, %63 : vector<2x32x256xf32>
    %c0_25 = arith.constant 0 : index
    %c0_26 = arith.constant 0 : index
    %c0_27 = arith.constant 0 : index
    %65 = vector.load %arg7[%c0_25, %c0_26, %c0_27] : memref<2x32x256xf32, #tpu.memory_space<vmem>>, vector<2x32x256xf32>
    tpu.vector_store %arg7[%c0_25, %c0_26, %c0_27], %64 {strides = array<i32>} : memref<2x32x256xf32, #tpu.memory_space<vmem>>, vector<2x32x256xf32>,
    return
  }
  func.func @transform_0(%arg0: i32) -> (i32, i32, i32) {
    %c0_i32 = arith.constant 0 : i32
    %c0_i32_0 = arith.constant 0 : i32
    %c0_i32_1 = arith.constant 0 : i32
    return %arg0, %c0_i32, %c0_i32_0 : i32, i32, i32
  }
  func.func @transform_1(%arg0: i32) -> (i32, i32) {
    %c0_i32 = arith.constant 0 : i32
    %c0_i32_0 = arith.constant 0 : i32
    %c0_i32_1 = arith.constant 0 : i32
    return %c0_i32, %c0_i32_0 : i32, i32
  }
  func.func @transform_2(%arg0: i32) -> (i32, i32) {
    %c0_i32 = arith.constant 0 : i32
    %c0_i32_0 = arith.constant 0 : i32
    %c0_i32_1 = arith.constant 0 : i32
    return %c0_i32, %c0_i32_0 : i32, i32
  }
  func.func @transform_3(%arg0: i32) -> (i32, i32) {
    %c0_i32 = arith.constant 0 : i32
    %c0_i32_0 = arith.constant 0 : i32
    %c0_i32_1 = arith.constant 0 : i32
    return %c0_i32, %c0_i32_0 : i32, i32
  }
  func.func @transform_4(%arg0: i32) -> (i32, i32) {
    %c0_i32 = arith.constant 0 : i32
    %c0_i32_0 = arith.constant 0 : i32
    %c0_i32_1 = arith.constant 0 : i32
    return %c0_i32, %c0_i32_0 : i32, i32
  }
  func.func @transform_5(%arg0: i32) -> (i32, i32) {
    %c0_i32 = arith.constant 0 : i32
    %c0_i32_0 = arith.constant 0 : i32
    %c0_i32_1 = arith.constant 0 : i32
    return %c0_i32, %c0_i32_0 : i32, i32
  }
  func.func @transform_6(%arg0: i32) -> (i32, i32, i32) {
    %c0_i32 = arith.constant 0 : i32
    %c0_i32_0 = arith.constant 0 : i32
    %c0_i32_1 = arith.constant 0 : i32
    return %arg0, %c0_i32, %c0_i32_0 : i32, i32, i32
  }
}

</mosaic_0001>

<bundles_post_ra>
// kernel: tpu_custom_call.1
= control target key start
LH: loop header
LB: loop body
LE: loop exit
PB: predicated region body
PF: predicated region fallthrough
CT: control target
= control target key end

     0   :  { %11 = vsyncpa [#allocation3], 0  ;;  %s835_s0 = inlined_call_operand.hbm [shape: f32[2,32,256], index: 0, kind: input, shape index: {}]   ;;  %s836_s1 = inlined_call_operand.vmem [shape: f32[8,256], index: 1, kind: input, shape index: {}]   ;;  %s837_s2 = inlined_call_operand.vmem [shape: f32[32,2], index: 2, kind: input, shape index: {}]   ;;  %s838_s3 = inlined_call_operand.vmem [shape: f32[1,2], index: 3, kind: input, shape index: {}]   ;;  %s839_s4 = inlined_call_operand.vmem [shape: f32[32,2], index: 4, kind: input, shape index: {}]   ;;  %s840_s5 = inlined_call_operand.vmem [shape: f32[32,1], index: 5, kind: input, shape index: {}]   ;;  %s841_s6 = inlined_call_operand.hbm [shape: f32[2,32,256], index: 6, kind: output, shape index: {}]  }
   0x1   :  { %12 = vsyncpa [#allocation4], 0  ;;  %s631_s21 = smov [#allocation2]   ;;  %s583_s25 = scalar_lea.hbm %s835_s0, 2048 }
   0x2   :  { %s18_s22 = sshll.u32 %s631_s21, 4  ;;  %p584_p0 = scmp.ne.s32.totalorder %s835_s0, %s583_s25  ;;  %s19_s22 = int_to_ptr.vmem [resolvable:$true] %s18_s22 }
   0x3   :  { %p587_p1 = scmp.lt.u32.totalorder %s583_s25, %s835_s0 }
   0x5   :  { %p589_p2 = pnand %p587_p1, %p584_p0 }
   0x7   :  { %592 = shalt.err (!%p589_p2)
}
   0x8   :  { %s593_s30 = scalar_lea.vmem %s19_s22, 2048  ;;  %p598_p4 = scmp.lt.s32.totalorder %s19_s22, %s19_s22 }
   0x9   :  { %p594_p3 = scmp.ne.s32.totalorder %s19_s22, %s593_s30  ;;  %p599_p5 = scmp.lt.s32.totalorder %s593_s30, %s593_s30 }
   0xb   :  { %p600_p6 = por %p599_p5, %p598_p4 }
   0xd   :  { %p601_p7 = pnand %p600_p6, %p594_p3 }
   0xf   :  { %604 = shalt.err (!%p601_p7)
}
  0x10   :  { %s632_s7 = smov 256   ;;  %s633_s8 = smov 16  }
  0x11   :  { %24 = dma.hbm_to_vmem [thread:$0]  %s835_s0, 2048, %s19_s22, [#allocation3], %s632_s7, %s632_s7, %s633_s8  }
  0x12   :  { %627 = dma.done.wait [#allocation3], 2048  }
  0x13   :  { %628 = vsyncadd [#allocation3], 4294965248  ;;  %v634_v0 = vmov 1   ;;  %v39_v1 = vld [vmem:[%s836_s1 + $0x8] sm:$0xff]  ;;  %v38_v2 = vld [vmem:[%s836_s1] sm:$0xff]  ;;  %v635_v24 = vmov 0  }
  0x14   :  { %548 = vset.pattern.permute.xlu1 %v634_v0  ;;  %547 = vset.pattern.permute.xlu0 %v634_v0  ;;  %v694_v3 = vld [vmem:[#allocation2 + $0x8] sm:$0xff]  ;;  %v698_v5 = vld [vmem:[#allocation2] sm:$0xff]  ;;  %v704_v7 = vld [vmem:[#allocation2 + $0x18] sm:$0xff]  ;;  %vm202_vm0 = vcmask 64512   ;;  %s636_s29 = smov 127  }
  0x15   :  { %69 = vmatprep.subr.mxu0 %v39_v1  ;;  %538 = vmatprep.subr.mxu1 %v39_v1  ;;  %v696_v4 = vld [vmem:[#allocation2 + $0x48] sm:$0xff]  ;;  %v700_v6 = vld [vmem:[#allocation2 + $0x40] sm:$0xff]  ;;  %v706_v8 = vld [vmem:[#allocation2 + $0x58] sm:$0xff] }
  0x16   :  { %70 = vmatpush1.xpose.msra.mxu0 %v38_v2  ;;  %539 = vmatpush1.xpose.msra.mxu1 %v38_v2  ;;  %v710_v9 = vld [vmem:[#allocation2 + $0x10] sm:$0xff]  ;;  %v40_v12 = vld [vmem:[%s837_s2] sm:$0xff]  ;;  %v722_v13 = vld [vmem:[#allocation2 + $0x28] sm:$0xff] }
  0x17   :  { %133 = vmatprep.mubr.f32.mxu0 %v694_v3  ;;  %153 = vmatprep.mubr.f32.mxu1 %v696_v4  ;;  %v714_v10 = vld [vmem:[#allocation2 + $0x50] sm:$0xff]  ;;  %v724_v14 = vld [vmem:[#allocation2 + $0x68] sm:$0xff]  ;;  %v43_v15 = vld [vmem:[%s837_s2 + $0x18] sm:$0xff] }
  0x18   :  { %v42_v11 = vld [vmem:[%s837_s2 + $0x10] sm:$0xff]  ;;  %268 = vperm.xlu0 %547, %v40_v12   ;;  %v41_v16 = vld [vmem:[%s837_s2 + $0x8] sm:$0xff]  ;;  %v736_v17 = vld [vmem:[#allocation2 + $0x20] sm:$0xff] }
  0x19   :  { %134 = vmatmul.mubr.f32.vlgmr.msra.gmra.mrb[0].mxu0 %v698_v5  ;;  %154 = vmatmul.mubr.f32.vlgmr.msra.gmra.mrb[0].mxu1 %v700_v6  ;;  %v738_v18 = vld [vmem:[#allocation2 + $0x60] sm:$0xff]  ;;  %v740_v19 = vld [vmem:[#allocation2 + $0x38] sm:$0xff]  ;;  %v751_v22 = vld [vmem:[#allocation2 + $0x30] sm:$0xff] }
  0x1a   :  { %138 = vmatprep.mubr.f32.mxu0 %v704_v7  ;;  %158 = vmatprep.mubr.f32.mxu1 %v706_v8  ;;  %v742_v20 = vld [vmem:[#allocation2 + $0x78] sm:$0xff]  ;;  %v44_v21 = vld [vmem:[%s838_s3] sm:$0x1]  ;;  %v753_v23 = vld [vmem:[#allocation2 + $0x70] sm:$0xff] }
  0x1b   :  { %276 = vperm.xlu1 %548, %v42_v11  }
  0x1c   :  { %272 = vperm.xlu0 %547, %v41_v16  }
  0x1d   :  { %139 = vmatmul.mubr.f32.gmra.mrb[2].mxu0 %v710_v9  ;;  %159 = vmatmul.mubr.f32.gmra.mrb[2].mxu1 %v714_v10 }
  0x1e   :  { %143 = vmatprep.mubr.f32.mxu0 %v722_v13  ;;  %163 = vmatprep.mubr.f32.mxu1 %v724_v14 }
  0x1f   :  { %280 = vperm.xlu1 %548, %v43_v15  }
  0x20   :  { %318 = vperm.xlu0 %547, %v44_v21  }
  0x21   :  { %144 = vmatmul.mubr.f32.gmra.mrb[4].mxu0 %v736_v17  ;;  %164 = vmatmul.mubr.f32.gmra.mrb[4].mxu1 %v738_v18 }
  0x22   :  { %148 = vmatprep.mubr.f32.mxu0 %v740_v19  ;;  %168 = vmatprep.mubr.f32.mxu1 %v742_v20 }
  0x23   :  { %549 = vset.pattern.permute.xlu1 %v635_v24 }
  0x24   :  { %176 = vperm.xlu1 %549, %v40_v12   ;;  %550 = vset.pattern.permute.xlu0 %v635_v24 }
  0x25   :  { %149 = vmatmul.mubr.f32.gmra.mrb[6].mxu0 %v751_v22  ;;  %169 = vmatmul.mubr.f32.gmra.mrb[6].mxu1 %v753_v23 }
  0x26   :  { %181 = vperm.xlu0 %550, %v41_v16  }
  0x28   :  { %186 = vperm.xlu1 %549, %v42_v11  }
  0x2a   :  { %231 = vperm.xlu0 %550, %v44_v21  }
  0x2c   :  { %191 = vperm.xlu1 %549, %v43_v15  }
  0x97   :  { %v269_v25 = vpop.permute.xlu0 %268 }
  0x9a   :  { %v277_v26 = vpop.permute.xlu1 %276 }
  0x9b   :  { %v273_v27 = vpop.permute.xlu0 %272 }
  0x9e   :  { %v281_v28 = vpop.permute.xlu1 %280 }
  0x9f   :  { %v757_v29 = vpop.permute.xlu0 %318 }
  0xa3   :  { %v177_v30 = vpop.permute.xlu1 %176 }
  0xa5   :  { %v182_v39 = vpop.permute.xlu0 %181 }
  0xa7   :  { %v187_v40 = vpop.permute.xlu1 %186 }
  0xab   :  { %v192_v15 = vpop.permute.xlu1 %191 }
  0xec   :  { %v135_v31 = vpop.f32.mrb[0].mxu0  ;;  %v155_v32 = vpop.f32.mrb[0].mxu1 }
  0xed   :  { %v137_v33 = vpop.f32.mrb[1].mxu0  ;;  %v198_v34 = vmul.f32 %v177_v30, %v155_v32  ;;  %v287_v35 = vmul.f32 %v269_v25, %v155_v32  ;;  %v157_v36 = vpop.f32.mrb[1].mxu1  ;;  %v194_v37 = vmul.f32 %v177_v30, %v135_v31  ;;  %v283_v38 = vmul.f32 %v269_v25, %v135_v31 }
  0xef   :  { %v216_v41 = vsel %vm202_vm0, %v198_v34, 0.0  ;;  %v304_v42 = vsel %vm202_vm0, %v287_v35, 0.0  ;;  %v203_v51 = vsel %vm202_vm0, %v194_v37, 0.0  ;;  %v291_v52 = vsel %vm202_vm0, %v283_v38, 0.0 }
  0xf0   :  { %v140_v43 = vpop.f32.mrb[2].mxu0  ;;  %v160_v44 = vpop.f32.mrb[2].mxu1 }
  0xf1   :  { %v195_v45 = vmul.f32 %v182_v39, %v140_v43  ;;  %v284_v46 = vmul.f32 %v273_v27, %v140_v43  ;;  %v199_v47 = vmul.f32 %v182_v39, %v160_v44  ;;  %v288_v48 = vmul.f32 %v273_v27, %v160_v44  ;;  %v142_v49 = vpop.f32.mrb[3].mxu0  ;;  %v162_v50 = vpop.f32.mrb[3].mxu1 }
  0xf3   :  { %v204_v53 = vsel %vm202_vm0, %v195_v45, 0.0  ;;  %v292_v54 = vsel %vm202_vm0, %v284_v46, 0.0  ;;  %v217_v55 = vsel %vm202_vm0, %v199_v47, 0.0  ;;  %v305_v56 = vsel %vm202_vm0, %v288_v48, 0.0 }
  0xf4   :  { %v205_v57 = vadd.f32 %v204_v53, %v203_v51  ;;  %v293_v58 = vadd.f32 %v292_v54, %v291_v52  ;;  %v218_v59 = vadd.f32 %v217_v55, %v216_v41  ;;  %v306_v60 = vadd.f32 %v305_v56, %v304_v42  ;;  %v145_v61 = vpop.f32.mrb[4].mxu0  ;;  %v165_v62 = vpop.f32.mrb[4].mxu1 }
  0xf5   :  { %v196_v63 = vmul.f32 %v187_v40, %v145_v61  ;;  %v285_v0 = vmul.f32 %v277_v26, %v145_v61  ;;  %v200_v1 = vmul.f32 %v187_v40, %v165_v62  ;;  %v289_v2 = vmul.f32 %v277_v26, %v165_v62  ;;  %v147_v11 = vpop.f32.mrb[5].mxu0  ;;  %v167_v12 = vpop.f32.mrb[5].mxu1 }
  0xf6   :  { %v234_v40 = vlaneseq }
  0xf7   :  { %v206_v16 = vsel %vm202_vm0, %v196_v63, 0.0  ;;  %v294_v21 = vsel %vm202_vm0, %v285_v0, 0.0  ;;  %v219_v24 = vsel %vm202_vm0, %v200_v1, 0.0  ;;  %v307_v25 = vsel %vm202_vm0, %v289_v2, 0.0 }
  0xf8   :  { %v207_v27 = vadd.f32 %v206_v16, %v205_v57  ;;  %v295_v30 = vadd.f32 %v294_v21, %v293_v58  ;;  %v220_v31 = vadd.f32 %v219_v24, %v218_v59  ;;  %v308_v32 = vadd.f32 %v307_v25, %v306_v60  ;;  %v150_v33 = vpop.f32.mrb[6].mxu0  ;;  %v170_v34 = vpop.f32.mrb[6].mxu1 }
  0xf9   :  { %v197_v35 = vmul.f32 %v192_v15, %v150_v33  ;;  %v286_v36 = vmul.f32 %v281_v28, %v150_v33  ;;  %v201_v26 = vmul.f32 %v192_v15, %v170_v34  ;;  %v290_v37 = vmul.f32 %v281_v28, %v170_v34  ;;  %v152_v38 = vpop.f32.mrb[7].mxu0  ;;  %v172_v39 = vpop.f32.mrb[7].mxu1 }
  0xfa   :  { %v235_v28 = vshrl.u32 %v234_v40, 7  ;;  %v232_v59 = vpop.permute.xlu0 %231 }
  0xfb   :  { %v208_v41 = vsel %vm202_vm0, %v197_v35, 0.0  ;;  %v296_v42 = vsel %vm202_vm0, %v286_v36, 0.0  ;;  %v221_v43 = vsel %vm202_vm0, %v201_v26, 0.0  ;;  %v309_v44 = vsel %vm202_vm0, %v290_v37, 0.0 }
  0xfc   :  { %v209_v45 = vadd.f32 %v208_v41, %v207_v27  ;;  %v297_v46 = vadd.f32 %v296_v42, %v295_v30  ;;  %v222_v47 = vadd.f32 %v221_v43, %v220_v31  ;;  %v310_v48 = vadd.f32 %v309_v44, %v308_v32  ;;  %v46_v43 = vld [vmem:[%s839_s4 + $0x8] sm:$0xff]  ;;  %v45_v44 = vld [vmem:[%s839_s4] sm:$0xff] }
  0xfd   :  { %v236_v62 = vsub.s32 0, %v235_v28 }
  0xfe   :  { %v210_v49 = vrot.slane %v209_v45, 4  ;;  %v298_v50 = vrot.slane %v297_v46, 4  ;;  %v223_v51 = vrot.slane %v222_v47, 4  ;;  %v311_v52 = vrot.slane %v310_v48, 4 }
  0xff   :  { %v237_v11 = vrot.slane %v232_v59, %v236_v62  ;;  %v324_v24 = vrot.slane %v757_v29, %v236_v62  ;;  %v50_v62 = vld [vmem:[%s840_s5 + $0x8] sm:$0xff] }
 0x100   :  { %v211_v53 = vadd.f32 %v210_v49, %v209_v45  ;;  %v299_v54 = vadd.f32 %v298_v50, %v297_v46  ;;  %v224_v55 = vadd.f32 %v223_v51, %v222_v47  ;;  %v312_v56 = vadd.f32 %v311_v52, %v310_v48  ;;  %v47_v49 = vld [vmem:[%s839_s4 + $0x10] sm:$0xff]  ;;  %v48_v50 = vld [vmem:[%s839_s4 + $0x18] sm:$0xff] }
 0x102   :  { %v300_v57 = vrot.slane %v299_v54, 2  ;;  %v313_v58 = vrot.slane %v312_v56, 2  ;;  %v212_v60 = vrot.slane %v211_v53, 2  ;;  %v225_v61 = vrot.slane %v224_v55, 2 }
 0x104   :  { %v213_v63 = vadd.f32 %v212_v60, %v211_v53  ;;  %v226_v0 = vadd.f32 %v225_v61, %v224_v55  ;;  %v314_v1 = vadd.f32 %v313_v58, %v312_v56  ;;  %v301_v2 = vadd.f32 %v300_v57, %v299_v54 }
 0x106   :  { %v214_v12 = vrot.slane %v213_v63, 1  ;;  %v227_v15 = vrot.slane %v226_v0, 1  ;;  %v315_v16 = vrot.slane %v314_v1, 1  ;;  %v302_v21 = vrot.slane %v301_v2, 1 }
 0x108   :  { %v215_v25 = vadd.f32 %v214_v12, %v213_v63  ;;  %v228_v27 = vadd.f32 %v227_v15, %v226_v0  ;;  %v316_v30 = vadd.f32 %v315_v16, %v314_v1  ;;  %v303_v31 = vadd.f32 %v302_v21, %v301_v2  ;;  %v49_v0 = vld [vmem:[%s840_s5] sm:$0xff] }
 0x10a   :  { %v238_v32 = vadd.f32 %v237_v11, %v215_v25  ;;  %v239_v33 = vadd.f32 %v237_v11, %v228_v27  ;;  %v326_v34 = vadd.f32 %v324_v24, %v316_v30  ;;  %v325_v35 = vadd.f32 %v324_v24, %v303_v31  ;;  %v51_v25 = vld [vmem:[%s840_s5 + $0x10] sm:$0xff]  ;;  %v52_v30 = vld [vmem:[%s840_s5 + $0x18] sm:$0xff]  ;;  %s637_s5 = smov [#allocation5]  }
 0x10b   :  { %s518_s0 = sshll.u32 %s637_s5, 4  ;;  %s519_s0 = int_to_ptr.vmem [resolvable:$true] %s518_s0 }
 0x10c   :  { %v328_v36 = vmax.f32 %v326_v34, 0.0  ;;  %v327_v26 = vmax.f32 %v325_v35, 0.0  ;;  %v241_v39 = vmax.f32 %v239_v33, 0.0  ;;  %v240_v40 = vmax.f32 %v238_v32, 0.0  ;;  %s605_s1 = scalar_lea.vmem %s519_s0, 2048  ;;  %p610_p9 = scmp.lt.s32.totalorder %s519_s0, %s519_s0 }
 0x10d   :  { %p606_p8 = scmp.ne.s32.totalorder %s519_s0, %s605_s1  ;;  %p611_p10 = scmp.lt.s32.totalorder %s605_s1, %s605_s1 }
 0x10e   :  { %v332_v37 = vsel %vm202_vm0, %v328_v36, 0.0  ;;  %v329_v38 = vsel %vm202_vm0, %v327_v26, 0.0  ;;  %v245_v29 = vsel %vm202_vm0, %v241_v39, 0.0  ;;  %v242_v41 = vsel %vm202_vm0, %v240_v40, 0.0 }
 0x10f   :  { %333 = vadd.xlane.f32.xlu0 %v332_v37  ;;  %330 = vadd.xlane.f32.xlu1 %v329_v38  ;;  %p612_p11 = por %p611_p10, %p610_p9 }
 0x111   :  { %p613_p12 = pnand %p612_p11, %p606_p8 }
 0x113   :  { %246 = vadd.xlane.f32.xlu1 %v245_v29  ;;  %243 = vadd.xlane.f32.xlu0 %v242_v41 }
 0x19c   :  { %v331_v42 = vpop.xlane.xlu1 %330  ;;  %v334_v48 = vpop.xlane.xlu0 %333 }
 0x19d   :  { %v335_v45 = vmul.f32 0.125, %v331_v42  ;;  %v336_v51 = vmul.f32 0.125, %v334_v48 }
 0x19f   :  { %v338_v46 = vmul.f32 %v335_v45, %v46_v43  ;;  %v337_v47 = vmul.f32 %v335_v45, %v45_v44  ;;  %v339_v52 = vmul.f32 %v335_v45, %v47_v49  ;;  %v340_v28 = vmul.f32 %v335_v45, %v48_v50 }
 0x1a0   :  { %v341_v53 = vmul.f32 %v336_v51, %v45_v44  ;;  %v342_v54 = vmul.f32 %v336_v51, %v46_v43  ;;  %v343_v55 = vmul.f32 %v336_v51, %v47_v49  ;;  %v344_v56 = vmul.f32 %v336_v51, %v48_v50  ;;  %v244_v57 = vpop.xlane.xlu0 %243  ;;  %v247_v59 = vpop.xlane.xlu1 %246 }
 0x1a1   :  { %355 = vrot.lane.b32.xlu1 %v338_v46, %s636_s29  ;;  %353 = vrot.lane.b32.xlu0 %v337_v47, %s636_s29  ;;  %v249_v58 = vmul.f32 0.125, %v244_v57  ;;  %v250_v12 = vmul.f32 0.125, %v247_v59 }
 0x1a3   :  { %v252_v60 = vmul.f32 %v249_v58, %v46_v43  ;;  %v251_v61 = vmul.f32 %v249_v58, %v45_v44  ;;  %v253_v21 = vmul.f32 %v249_v58, %v47_v49  ;;  %v254_v24 = vmul.f32 %v249_v58, %v48_v50 }
 0x1a4   :  { %v255_v36 = vmul.f32 %v250_v12, %v45_v44  ;;  %v256_v38 = vmul.f32 %v250_v12, %v46_v43  ;;  %v257_v46 = vmul.f32 %v250_v12, %v47_v49  ;;  %v258_v51 = vmul.f32 %v250_v12, %v48_v50 }
 0x1a5   :  { %357 = vrot.lane.b32.xlu1 %v339_v52, %s636_s29  ;;  %359 = vrot.lane.b32.xlu0 %v340_v28, %s636_s29 }
 0x1a9   :  { %361 = vrot.lane.b32.xlu1 %v341_v53, %s636_s29  ;;  %363 = vrot.lane.b32.xlu0 %v342_v54, %s636_s29 }
 0x1ad   :  { %365 = vrot.lane.b32.xlu1 %v343_v55, %s636_s29  ;;  %367 = vrot.lane.b32.xlu0 %v344_v56, %s636_s29 }
 0x213   :  { %v356_v63 = vpop.permute.xlu1 %355  ;;  %v354_v1 = vpop.permute.xlu0 %353 }
 0x214   :  { %v378_v2 = vadd.f32 %v356_v63, %v252_v60  ;;  %v377_v11 = vadd.f32 %v354_v1, %v251_v61 }
 0x216   :  { %v386_v15 = vadd.f32 %v378_v2, %v50_v62  ;;  %v385_v16 = vadd.f32 %v377_v11, %v49_v0 }
 0x217   :  { %v358_v27 = vpop.permute.xlu1 %357  ;;  %v360_v31 = vpop.permute.xlu0 %359 }
 0x218   :  { %v531_v32 = vmul.f32 -1.442695, %v386_v15  ;;  %v530_v33 = vmul.f32 -1.442695, %v385_v16  ;;  %v379_v34 = vadd.f32 %v358_v27, %v253_v21  ;;  %v380_v35 = vadd.f32 %v360_v31, %v254_v24 }
 0x21a   :  { %551 = vpow2.f32 %v531_v32  ;;  %v387_v26 = vadd.f32 %v379_v34, %v51_v25  ;;  %v388_v37 = vadd.f32 %v380_v35, %v52_v30 }
 0x21b   :  { %553 = vpow2.f32 %v530_v33  ;;  %v362_v39 = vpop.permute.xlu1 %361  ;;  %v364_v40 = vpop.permute.xlu0 %363 }
 0x21c   :  { %v532_v29 = vmul.f32 -1.442695, %v387_v26  ;;  %v533_v41 = vmul.f32 -1.442695, %v388_v37  ;;  %v381_v42 = vadd.f32 %v362_v39, %v255_v36  ;;  %v382_v45 = vadd.f32 %v364_v40, %v256_v38 }
 0x21e   :  { %555 = vpow2.f32 %v532_v29  ;;  %v389_v47 = vadd.f32 %v381_v42, %v49_v0  ;;  %v390_v48 = vadd.f32 %v382_v45, %v50_v62 }
 0x21f   :  { %557 = vpow2.f32 %v533_v41  ;;  %v366_v52 = vpop.permute.xlu1 %365  ;;  %v368_v28 = vpop.permute.xlu0 %367 }
 0x220   :  { %v534_v44 = vmul.f32 -1.442695, %v389_v47  ;;  %v535_v53 = vmul.f32 -1.442695, %v390_v48  ;;  %v383_v54 = vadd.f32 %v366_v52, %v257_v46  ;;  %v384_v55 = vadd.f32 %v368_v28, %v258_v51 }
 0x222   :  { %559 = vpow2.f32 %v534_v44  ;;  %v391_v43 = vadd.f32 %v383_v54, %v51_v25  ;;  %v392_v56 = vadd.f32 %v384_v55, %v52_v30 }
 0x223   :  { %561 = vpow2.f32 %v535_v53 }
 0x224   :  { %v552_v57 = vpop.eup %551  ;;  %v536_v58 = vmul.f32 -1.442695, %v391_v43  ;;  %v537_v49 = vmul.f32 -1.442695, %v392_v56 }
 0x225   :  { %v554_v59 = vpop.eup %553  ;;  %v418_v60 = vadd.f32 1.0, %v552_v57 }
 0x226   :  { %v417_v61 = vadd.f32 1.0, %v554_v59  ;;  %563 = vpow2.f32 %v536_v58 }
 0x227   :  { %565 = vrcp.f32 %v418_v60 }
 0x228   :  { %v556_v50 = vpop.eup %555  ;;  %567 = vrcp.f32 %v417_v61 }
 0x229   :  { %v558_v62 = vpop.eup %557  ;;  %v419_v63 = vadd.f32 1.0, %v556_v50  ;;  %569 = vpow2.f32 %v537_v49 }
 0x22a   :  { %v420_v0 = vadd.f32 1.0, %v558_v62 }
 0x22b   :  { %571 = vrcp.f32 %v419_v63 }
 0x22c   :  { %v560_v1 = vpop.eup %559  ;;  %573 = vrcp.f32 %v420_v0 }
 0x22d   :  { %v562_v2 = vpop.eup %561  ;;  %v421_v11 = vadd.f32 1.0, %v560_v1 }
 0x22e   :  { %v422_v12 = vadd.f32 1.0, %v562_v2 }
 0x22f   :  { %575 = vrcp.f32 %v421_v11 }
 0x230   :  { %v564_v15 = vpop.eup %563  ;;  %577 = vrcp.f32 %v422_v12 }
 0x231   :  { %v566_v16 = vpop.eup %565  ;;  %v423_v21 = vadd.f32 1.0, %v564_v15 }
 0x232   :  { %v568_v24 = vpop.eup %567  ;;  %448 = vperm.xlu0 %550, %v566_v16  }
 0x233   :  { %v570_v25 = vpop.eup %569  ;;  %579 = vrcp.f32 %v423_v21  ;;  %443 = vperm.xlu1 %549, %v568_v24  }
 0x234   :  { %v424_v27 = vadd.f32 1.0, %v570_v25 }
 0x235   :  { %v572_v30 = vpop.eup %571 }
 0x236   :  { %v574_v31 = vpop.eup %573  ;;  %581 = vrcp.f32 %v424_v27 }
 0x237   :  { %453 = vperm.xlu1 %549, %v572_v30   ;;  %458 = vperm.xlu0 %550, %v574_v31  }
 0x239   :  { %v576_v32 = vpop.eup %575 }
 0x23a   :  { %v578_v33 = vpop.eup %577 }
 0x23b   :  { %463 = vperm.xlu1 %549, %v576_v32   ;;  %468 = vperm.xlu0 %550, %v578_v33  }
 0x23d   :  { %v580_v34 = vpop.eup %579 }
 0x23f   :  { %473 = vperm.xlu1 %549, %v580_v34  }
 0x240   :  { %v582_v35 = vpop.eup %581 }
 0x241   :  { %478 = vperm.xlu0 %550, %v582_v35  }
 0x2b1   :  { %v449_v36 = vpop.permute.xlu0 %448 }
 0x2b2   :  { %v444_v26 = vpop.permute.xlu1 %443  ;;  %v483_v37 = vmul.f32 %v449_v36, %v710_v9  ;;  %v484_v38 = vmul.f32 %v449_v36, %v704_v7 }
 0x2b3   :  { %v481_v39 = vmul.f32 %v444_v26, %v698_v5  ;;  %v482_v40 = vmul.f32 %v444_v26, %v694_v3 }
 0x2b4   :  { %499 = vst [vmem:[#allocation5 + $0x10] sm:$0xff] %v483_v37  ;;  %500 = vst [vmem:[#allocation5 + $0x18] sm:$0xff] %v484_v38 }
 0x2b5   :  { %497 = vst [vmem:[#allocation5] sm:$0xff] %v481_v39  ;;  %498 = vst [vmem:[#allocation5 + $0x8] sm:$0xff] %v482_v40 }
 0x2b6   :  { %v454_v29 = vpop.permute.xlu1 %453  ;;  %v459_v41 = vpop.permute.xlu0 %458 }
 0x2b7   :  { %v485_v42 = vmul.f32 %v454_v29, %v736_v17  ;;  %v486_v45 = vmul.f32 %v454_v29, %v722_v13  ;;  %v487_v46 = vmul.f32 %v459_v41, %v751_v22  ;;  %v488_v9 = vmul.f32 %v459_v41, %v740_v19 }
 0x2b9   :  { %501 = vst [vmem:[#allocation5 + $0x20] sm:$0xff] %v485_v42  ;;  %502 = vst [vmem:[#allocation5 + $0x28] sm:$0xff] %v486_v45 }
 0x2ba   :  { %503 = vst [vmem:[#allocation5 + $0x30] sm:$0xff] %v487_v46  ;;  %504 = vst [vmem:[#allocation5 + $0x38] sm:$0xff] %v488_v9  ;;  %v464_v5 = vpop.permute.xlu1 %463  ;;  %v469_v3 = vpop.permute.xlu0 %468 }
 0x2bb   :  { %v489_v7 = vmul.f32 %v464_v5, %v700_v6  ;;  %v490_v47 = vmul.f32 %v464_v5, %v696_v4  ;;  %v491_v48 = vmul.f32 %v469_v3, %v714_v10  ;;  %v492_v17 = vmul.f32 %v469_v3, %v706_v8 }
 0x2bd   :  { %505 = vst [vmem:[#allocation5 + $0x40] sm:$0xff] %v489_v7  ;;  %506 = vst [vmem:[#allocation5 + $0x48] sm:$0xff] %v490_v47 }
 0x2be   :  { %507 = vst [vmem:[#allocation5 + $0x50] sm:$0xff] %v491_v48  ;;  %508 = vst [vmem:[#allocation5 + $0x58] sm:$0xff] %v492_v17  ;;  %v474_v13 = vpop.permute.xlu1 %473 }
 0x2bf   :  { %v493_v19 = vmul.f32 %v474_v13, %v738_v18  ;;  %v494_v22 = vmul.f32 %v474_v13, %v724_v14 }
 0x2c0   :  { %v479_v51 = vpop.permute.xlu0 %478 }
 0x2c1   :  { %509 = vst [vmem:[#allocation5 + $0x60] sm:$0xff] %v493_v19  ;;  %510 = vst [vmem:[#allocation5 + $0x68] sm:$0xff] %v494_v22  ;;  %v495_v4 = vmul.f32 %v479_v51, %v753_v23  ;;  %v496_v6 = vmul.f32 %v479_v51, %v742_v20 }
 0x2c3   :  { %511 = vst [vmem:[#allocation5 + $0x70] sm:$0xff] %v495_v4  ;;  %512 = vst [vmem:[#allocation5 + $0x78] sm:$0xff] %v496_v6 }
 0x2c4   :  { %616 = shalt.err (!%p613_p12)
}
 0x2c5   :  { %s617_s17 = scalar_lea.hbm %s841_s6, 2048 }
 0x2c6   :  { %p618_p13 = scmp.ne.s32.totalorder %s841_s6, %s617_s17  ;;  %p621_p0 = scmp.lt.u32.totalorder %s617_s17, %s841_s6 }
 0x2c8   :  { %p623_p1 = pnand %p621_p0, %p618_p13 }
 0x2ca   :  { %626 = shalt.err (!%p623_p1)
}
 0x2cb   :  { %524 = dma.vmem_to_hbm [thread:$0]  %s519_s0, 2048, %s841_s6, [#allocation4], %s632_s7, %s632_s7, %s633_s8  }
 0x2cc   :  { %629 = dma.done.wait [#allocation4], 2048  }
 0x2cd   :  { %630 = vsyncadd [#allocation4], 4294965248 }
 0x2ce   :  { %528 = vsyncpa [#allocation3], 1 }
 0x2cf   :  { %529 = vsyncpa [#allocation4], 1 }

</bundles_post_ra>
